<compile_context>
chip_gen: v5e
topology: v5e:2x2
jax: 0.10.0
libtpu: 0.0.40
codegen_flags: <defaults>
</compile_context>

<pallas_src>
import functools

import jax
import jax.numpy as jnp
from jax import lax
from jax.experimental import pallas as pl
from jax.experimental.pallas import tpu as pltpu


def _round_up(x, m):
    return ((x + m - 1) // m) * m


def _rv_tconv_kernel(x_ref, w_ref, b_ref, o_ref, *, cop):
    # x_ref: (Kc_pad, hw_tile)   stacked [mean-patches ; var-patches]
    # w_ref: (2*Cop, Kc_pad)     block-diagonal [[Wm, 0], [0, Wv]]
    # b_ref: (2*Cop, 1)          [bias ; 0]
    # o_ref: (2*Cop, hw_tile)    rows [0, Cop): mean, rows [Cop, 2*Cop): var
    res = jnp.dot(w_ref[...], x_ref[...], preferred_element_type=jnp.float32)
    row = lax.broadcasted_iota(jnp.int32, res.shape, 0)
    # mean rows: + bias ; var rows: abs()
    res = jnp.where(row < cop, res + b_ref[...], jnp.abs(res))
    o_ref[...] = res.astype(o_ref.dtype)


@functools.partial(jax.jit, static_argnames=("stride", "padding",
                                             "output_padding", "dilation"))
def rv_transpose_conv2d(x, weight, bias, *, stride=(1, 1), padding=(0, 0),
                        output_padding=(0, 0), dilation=(1, 1)):
    """x: (N, 2, C_in, H, W); weight: (C_in, C_out, Kh, Kw); bias: (C_out,) or None."""
    N, two, C_in, H, W = x.shape
    assert two == 2
    _, C_out, Kh, Kw = weight.shape
    sH, sW = stride
    pH, pW = padding
    opH, opW = output_padding
    dH, dW = dilation
    dtype = x.dtype

    Hout = (H - 1) * sH - 2 * pH + dH * (Kh - 1) + opH + 1
    Wout = (W - 1) * sW - 2 * pW + dW * (Kw - 1) + opW + 1
    HW = Hout * Wout
    KK = Kh * Kw

    LANE = 128
    HW_TILE_CAP = 1024
    hw_tile = min(_round_up(HW, LANE), HW_TILE_CAP)
    HWp = _round_up(HW, hw_tile)
    n_hw = HWp // hw_tile

    Kc = 2 * KK * C_in
    Kc_pad = _round_up(Kc, 8)
    Cop = _round_up(C_out, 8)

    # --- stride-dilate + (possibly negative) pad, then im2col (contiguous) ---
    plh = dH * (Kh - 1) - pH
    plw = dW * (Kw - 1) - pW

    def dilate_pad(z):  # z: (N, C_in, H, W)
        cfg = ((0, 0, 0), (0, 0, 0),
               (plh, plh + opH, sH - 1),
               (plw, plw + opW, sW - 1))
        return lax.pad(z, jnp.array(0, z.dtype), cfg)

    def im2col(y):  # y: (N, C_in, yHp, yWp) -> (N, KK*C_in, HW)
        taps = []
        for kh in range(Kh):
            for kw in range(Kw):
                sl = y[:, :, kh * dH:kh * dH + Hout, kw * dW:kw * dW + Wout]
                taps.append(sl.reshape(N, C_in, HW))
        return jnp.concatenate(taps, axis=1)

    xm = im2col(dilate_pad(x[:, 0]))
    xv = im2col(dilate_pad(x[:, 1]))

    X = jnp.zeros((N, Kc_pad, HWp), dtype)
    X = X.at[:, :KK * C_in, :HW].set(xm)
    X = X.at[:, KK * C_in:Kc, :HW].set(xv)

    # --- block-diagonal fused weights (spatially flipped) ---
    wflip = weight[:, :, ::-1, ::-1]                               # (Ci, Co, Kh, Kw)
    w_m = jnp.transpose(wflip, (1, 2, 3, 0)).reshape(C_out, KK * C_in)
    w_v = jnp.transpose(wflip ** 2, (1, 2, 3, 0)).reshape(C_out, KK * C_in)
    W_blk = jnp.zeros((2 * Cop, Kc_pad), dtype)
    W_blk = W_blk.at[:C_out, :KK * C_in].set(w_m)
    W_blk = W_blk.at[Cop:Cop + C_out, KK * C_in:Kc].set(w_v)

    b_blk = jnp.zeros((2 * Cop, 1), dtype)
    if bias is not None:
        b_blk = b_blk.at[:C_out, 0].set(bias)

    # --- VMEM budget: 2x double-buffered in/out blocks + resident weights ---
    isz = jnp.dtype(dtype).itemsize
    blk_in = Kc_pad * hw_tile * isz
    blk_out = 2 * Cop * hw_tile * isz
    w_bytes = 2 * Cop * (Kc_pad + 1) * isz
    vmem_limit = int(min(max(3 * (blk_in + blk_out) + 2 * w_bytes + (4 << 20),
                             8 << 20), 32 << 20))

    out = pl.pallas_call(
        functools.partial(_rv_tconv_kernel, cop=Cop),
        out_shape=jax.ShapeDtypeStruct((N, 2 * Cop, HWp), dtype),
        grid=(N, n_hw),
        in_specs=[
            pl.BlockSpec((pl.Squeezed(), Kc_pad, hw_tile),
                         lambda n, t: (n, 0, t)),
            pl.BlockSpec((2 * Cop, Kc_pad), lambda n, t: (0, 0)),
            pl.BlockSpec((2 * Cop, 1), lambda n, t: (0, 0)),
        ],
        out_specs=pl.BlockSpec((pl.Squeezed(), 2 * Cop, hw_tile),
                               lambda n, t: (n, 0, t)),
        compiler_params=pltpu.CompilerParams(
            dimension_semantics=("parallel", "parallel"),
            vmem_limit_bytes=vmem_limit),
    )(X, W_blk, b_blk)

    out_m = out[:, :C_out, :HW].reshape(N, C_out, Hout, Wout)
    out_v = out[:, Cop:Cop + C_out, :HW].reshape(N, C_out, Hout, Wout)
    return jnp.stack([out_m, out_v], axis=1)


def _reference(x, weight, bias, stride, padding, output_padding, dilation):
    """Pure-JAX reference matching torch.nn.functional.conv_transpose2d."""
    sH, sW = stride
    pH, pW = padding
    opH, opW = output_padding
    dH, dW = dilation
    Kh, Kw = weight.shape[2], weight.shape[3]

    def tconv(z, w, b):
        rhs = jnp.transpose(w, (1, 0, 2, 3))[:, :, ::-1, ::-1]  # OIHW, flipped
        out = lax.conv_general_dilated(
            z, rhs,
            window_strides=(1, 1),
            padding=((dH * (Kh - 1) - pH, dH * (Kh - 1) - pH + opH),
                     (dW * (Kw - 1) - pW, dW * (Kw - 1) - pW + opW)),
            lhs_dilation=(sH, sW),
            rhs_dilation=(dH, dW),
            dimension_numbers=("NCHW", "OIHW", "NCHW"))
        if b is not None:
            out = out + b[None, :, None, None]
        return out

    out_mean = tconv(x[:, 0], weight, bias)
    out_var = jnp.abs(tconv(x[:, 1], weight ** 2, None))
    return jnp.stack([out_mean, out_var], axis=1)


if __name__ == "__main__":
    # Small config consistent with the module.
    N, C_in, C_out = 2, 4, 8
    H = W = 8
    K = 3
    stride = (2, 2)
    padding = (1, 1)
    output_padding = (1, 1)
    dilation = (1, 1)

    key = jax.random.PRNGKey(0)
    kx, kw, kb = jax.random.split(key, 3)

    # Parameter init mimicking kaiming_uniform_(a=sqrt(5)):
    # bound = 1/sqrt(fan_in), fan_in = (C_out/groups) * Kh * Kw for ConvTranspose weight.
    fan_in = C_out * K * K
    bound = 1.0 / (fan_in ** 0.5)
    weight = jax.random.uniform(kw, (C_in, C_out, K, K), jnp.float32,
                                minval=-bound, maxval=bound)
    bias = jax.random.uniform(kb, (C_out,), jnp.float32,
                              minval=-bound, maxval=bound)

    x = jax.random.normal(kx, (N, 2, C_in, H, W), jnp.float32)
    x = x.at[:, 1].set(jnp.abs(x[:, 1]))  # variance channel is non-negative

    out = rv_transpose_conv2d(x, weight, bias, stride=stride, padding=padding,
                              output_padding=output_padding, dilation=dilation)
    out = jax.block_until_ready(out)

    ref = _reference(x, weight, bias, stride, padding, output_padding, dilation)
    assert out.shape == ref.shape, (out.shape, ref.shape)
    max_err = float(jnp.max(jnp.abs(out - ref)))
    assert max_err < 1e-3, f"max abs error {max_err}"

    print("KERNEL_OK")
</pallas_src>

<mosaic_0001>
module attributes {stable_mosaic.version = 11 : i64} {
  func.func @_rv_tconv_kernel(%arg0: i32, %arg1: i32, %arg2: memref<1x72x256xf32, #tpu.memory_space<vmem>>, %arg3: memref<16x72xf32, #tpu.memory_space<vmem>>, %arg4: memref<16x1xf32, #tpu.memory_space<vmem>>, %arg5: memref<1x16x256xf32, #tpu.memory_space<vmem>>) attributes {dimension_semantics = [#tpu.dimension_semantics<parallel>, #tpu.dimension_semantics<parallel>], iteration_bounds = array<i64: 2, 1>, scalar_prefetch = 0 : i64, scratch_operands = 0 : i64, tpu.core_type = #tpu.core_type<tc>, window_params = [{transform_indices = @transform_0, window_bounds = array<i64: 1, 72, 256>}, {pipeline_mode = #tpu.pipeline_mode<synchronous>, transform_indices = @transform_1, window_bounds = array<i64: 16, 72>}, {pipeline_mode = #tpu.pipeline_mode<synchronous>, transform_indices = @transform_2, window_bounds = array<i64: 16, 1>}, {transform_indices = @transform_3, window_bounds = array<i64: 1, 16, 256>}]} {
    %c0 = arith.constant 0 : index
    %c0_0 = arith.constant 0 : index
    %0 = vector.load %arg3[%c0, %c0_0] : memref<16x72xf32, #tpu.memory_space<vmem>>, vector<16x72xf32>
    %c0_1 = arith.constant 0 : index
    %c0_2 = arith.constant 0 : index
    %c0_3 = arith.constant 0 : index
    %1 = vector.load %arg2[%c0_1, %c0_2, %c0_3] : memref<1x72x256xf32, #tpu.memory_space<vmem>>, vector<1x72x256xf32>
    %2 = vector.shape_cast %1 : vector<1x72x256xf32> to vector<72x256xf32>
    %cst = arith.constant dense<0.000000e+00> : vector<16x256xf32>
    %3 = tpu.matmul %0, %2, %cst {dimension_numbers = #tpu.dot_dimension_numbers<[1], [0], [0], [1], [0, 0, 1, 1], [], []>} : vector<16x72xf32>, vector<72x256xf32>, vector<16x256xf32> -> vector<16x256xf32>
    %4 = tpu.iota {dimensions = array<i32: 0>} : vector<16x256xi32>
    %c8_i32 = arith.constant 8 : i32
    %5 = vector.broadcast %c8_i32 : i32 to vector<16x256xi32>
    %6 = arith.cmpi slt, %4, %5 : vector<16x256xi32>
    %c0_4 = arith.constant 0 : index
    %c0_5 = arith.constant 0 : index
    %7 = vector.load %arg4[%c0_4, %c0_5] : memref<16x1xf32, #tpu.memory_space<vmem>>, vector<16x1xf32>
    %8 = vector.broadcast %7 : vector<16x1xf32> to vector<16x256xf32>
    %9 = arith.addf %3, %8 : vector<16x256xf32>
    %10 = math.absf %3 : vector<16x256xf32>
    %11 = arith.select %6, %9, %10 : vector<16x256xi1>, vector<16x256xf32>
    %c0_6 = arith.constant 0 : index
    %c0_7 = arith.constant 0 : index
    %c0_8 = arith.constant 0 : index
    %12 = vector.load %arg5[%c0_6, %c0_7, %c0_8] : memref<1x16x256xf32, #tpu.memory_space<vmem>>, vector<1x16x256xf32>
    %13 = vector.shape_cast %12 : vector<1x16x256xf32> to vector<16x256xf32>
    %14 = vector.shape_cast %11 : vector<16x256xf32> to vector<1x16x256xf32>
    tpu.vector_store %arg5[%c0_6, %c0_7, %c0_8], %14 {strides = array<i32>} : memref<1x16x256xf32, #tpu.memory_space<vmem>>, vector<1x16x256xf32>,
    return
  }
  func.func @transform_0(%arg0: i32, %arg1: i32) -> (i32, i32, i32) {
    %c0_i32 = arith.constant 0 : i32
    %c0_i32_0 = arith.constant 0 : i32
    return %arg0, %c0_i32, %arg1 : i32, i32, i32
  }
  func.func @transform_1(%arg0: i32, %arg1: i32) -> (i32, i32) {
    %c0_i32 = arith.constant 0 : i32
    %c0_i32_0 = arith.constant 0 : i32
    %c0_i32_1 = arith.constant 0 : i32
    return %c0_i32, %c0_i32_0 : i32, i32
  }
  func.func @transform_2(%arg0: i32, %arg1: i32) -> (i32, i32) {
    %c0_i32 = arith.constant 0 : i32
    %c0_i32_0 = arith.constant 0 : i32
    %c0_i32_1 = arith.constant 0 : i32
    return %c0_i32, %c0_i32_0 : i32, i32
  }
  func.func @transform_3(%arg0: i32, %arg1: i32) -> (i32, i32, i32) {
    %c0_i32 = arith.constant 0 : i32
    %c0_i32_0 = arith.constant 0 : i32
    return %arg0, %c0_i32, %arg1 : i32, i32, i32
  }
}

</mosaic_0001>

<bundles_post_ra>
// kernel: rv_transpose_conv2d.1
= control target key start
LH: loop header
LB: loop body
LE: loop exit
PB: predicated region body
PF: predicated region fallthrough
CT: control target
= control target key end

     0   :  { %s508_s12 = smov 0   ;;  %s510_s13 = smov 0   ;;  %s574_s0 = inlined_call_operand.vmem [shape: f32[2,72,256], index: 0, kind: input, shape index: {}]   ;;  %s575_s1 = inlined_call_operand.vmem [shape: f32[16,72], index: 1, kind: input, shape index: {}]   ;;  %s576_s2 = inlined_call_operand.vmem [shape: f32[16,1], index: 2, kind: input, shape index: {}]   ;;  %s577_s3 = inlined_call_operand.vmem [shape: f32[2,16,256], index: 3, kind: output, shape index: {}]  }
   0x1   :  { %s512_s14 = smov 0  }
   0x2 LB: > { %s25_s15 = sadd.s32 1, %s481_s13  ;;  %p407_p0 = scmp.ge.s32.totalorder %s485_s14, 1  ;;  %s485_s14 = sphi %s512_s14, %s13_s14   ;;  %s481_s13 = sphi %s510_s13, %s579_s13   ;;  %s477_s12 = sphi %s508_s12, %s578_s12  }
   0x3   : > { %p27_p1 = scmp.ge.s32.totalorder %s25_s15, 2  ;;  %p158_p2 = scmp.lt.s32.totalorder %s485_s14, 3 }
   0x5   : > { %s581_s15 = smov (%p27_p1, %s25_s15), 0  ;;  %p159_p3 = pnand %p407_p0, %p158_p2 }
   0x6   : > { %p191_p4 = scmp.lt.s32.totalorder (!%p159_p3), %s477_s12, 1 }
   0x7   : > { %162 = sbr.rel (%p159_p3) target bundleno = 170 (0xaa), region = 32 }
   0xc   : > { %v288_v0 = vld [vmem:[%s576_s2] sm:$0xff]  ;;  %v487_v1 = vmov 0   ;;  %s583_s12 = smov (!%p191_p4, %s477_s12), 1  ;;  %v211_v20 = vld [vmem:[%s575_s1 + $0x8] sm:$0xff]  ;;  %vm230_vm0 = vcmask 588800  }
   0xd   : > { %462 = vset.pattern.permute.xlu0 %v487_v1  ;;  %s436_s18 = smul.u32 144, %s583_s12  ;;  %v210_v21 = vld [vmem:[%s575_s1] sm:$0xff]  ;;  %s417_s26 = sshll.u32 %s583_s12, 5 }
   0xe   : > { %292 = vperm.xlu0 %462, %v288_v0   ;;  %s208_s29 = scalar_lea.vmem %s577_s3, %s417_s26 }
   0xf   : > { %s535_s21 = scalar_lea.vmem %s574_s0, %s436_s18 }
  0x10   : > { %v228_v2 = vld [vmem:[%s535_s21 + $0x80] sm:$0xff]  ;;  %v229_v3 = vld [vmem:[%s535_s21 + $0x88] sm:$0xff]  ;;  %v226_v4 = vld [vmem:[%s535_s21 + $0x70] sm:$0xff] }
  0x11   : > { %418 = vmatpush.msra.mxu2 %v228_v2  ;;  %427 = vmatpush.msra.mxu3 %v229_v3  ;;  %v227_v5 = vld [vmem:[%s535_s21 + $0x78] sm:$0xff]  ;;  %v224_v6 = vld [vmem:[%s535_s21 + $0x60] sm:$0xff]  ;;  %v225_v7 = vld [vmem:[%s535_s21 + $0x68] sm:$0xff] }
  0x12   : > { %244 = vmatpush.msra.mxu0 %v228_v2  ;;  %267 = vmatpush.msra.mxu1 %v229_v3  ;;  %v222_v8 = vld [vmem:[%s535_s21 + $0x50] sm:$0xff]  ;;  %v223_v9 = vld [vmem:[%s535_s21 + $0x58] sm:$0xff]  ;;  %v220_v10 = vld [vmem:[%s535_s21 + $0x40] sm:$0xff] }
  0x13   : > { %419 = vmatpush.msra.mxu2 %v226_v4  ;;  %428 = vmatpush.msra.mxu3 %v227_v5  ;;  %v221_v11 = vld [vmem:[%s535_s21 + $0x48] sm:$0xff]  ;;  %v218_v12 = vld [vmem:[%s535_s21 + $0x30] sm:$0xff]  ;;  %v219_v13 = vld [vmem:[%s535_s21 + $0x38] sm:$0xff] }
  0x14   : > { %245 = vmatpush.msra.mxu0 %v226_v4  ;;  %268 = vmatpush.msra.mxu1 %v227_v5  ;;  %v216_v14 = vld [vmem:[%s535_s21 + $0x20] sm:$0xff]  ;;  %v217_v15 = vld [vmem:[%s535_s21 + $0x28] sm:$0xff]  ;;  %v214_v16 = vld [vmem:[%s535_s21 + $0x10] sm:$0xff] }
  0x15   : > { %420 = vmatpush.msra.mxu2 %v224_v6  ;;  %429 = vmatpush.msra.mxu3 %v225_v7  ;;  %v215_v17 = vld [vmem:[%s535_s21 + $0x18] sm:$0xff]  ;;  %v212_v18 = vld [vmem:[%s535_s21] sm:$0xff]  ;;  %v213_v19 = vld [vmem:[%s535_s21 + $0x8] sm:$0xff] }
  0x16   : > { %246 = vmatpush.msra.mxu0 %v224_v6  ;;  %269 = vmatpush.msra.mxu1 %v225_v7 }
  0x17   : > { %421 = vmatpush.msra.mxu2 %v222_v8  ;;  %430 = vmatpush.msra.mxu3 %v223_v9 }
  0x18   : > { %247 = vmatpush.msra.mxu0 %v222_v8  ;;  %270 = vmatpush.msra.mxu1 %v223_v9 }
  0x19   : > { %422 = vmatpush.msra.mxu2 %v220_v10  ;;  %431 = vmatpush.msra.mxu3 %v221_v11 }
  0x1a   : > { %248 = vmatpush.msra.mxu0 %v220_v10  ;;  %271 = vmatpush.msra.mxu1 %v221_v11 }
  0x1b   : > { %423 = vmatpush.msra.mxu2 %v218_v12  ;;  %432 = vmatpush.msra.mxu3 %v219_v13 }
  0x1c   : > { %249 = vmatpush.msra.mxu0 %v218_v12  ;;  %272 = vmatpush.msra.mxu1 %v219_v13 }
  0x1d   : > { %424 = vmatpush.msra.mxu2 %v216_v14  ;;  %433 = vmatpush.msra.mxu3 %v217_v15 }
  0x1e   : > { %250 = vmatpush.msra.mxu0 %v216_v14  ;;  %273 = vmatpush.msra.mxu1 %v217_v15 }
  0x1f   : > { %425 = vmatpush.msra.mxu2 %v214_v16  ;;  %434 = vmatpush.msra.mxu3 %v215_v17 }
  0x20   : > { %251 = vmatpush.msra.mxu0 %v214_v16  ;;  %274 = vmatpush.msra.mxu1 %v215_v17 }
  0x21   : > { %426 = vmatpush.msra.mxu2 %v212_v18  ;;  %435 = vmatpush.msra.mxu3 %v213_v19 }
  0x22   : > { %412 = vmatmul.msk.f32.vlgmr.msra.gmra.mxu2 %vm230_vm0, %v211_v20  ;;  %414 = vmatmul.msk.f32.vlgmr.msra.gmra.mxu3 %vm230_vm0, %v211_v20 }
  0x23   : > { %252 = vmatpush.msra.mxu0 %v212_v18  ;;  %275 = vmatpush.msra.mxu1 %v213_v19 }
  0x24   : > { %411 = vmatmul.msk.f32.vlgmr.msra.gmra.mxu0 %vm230_vm0, %v210_v21  ;;  %413 = vmatmul.msk.f32.vlgmr.msra.gmra.mxu1 %vm230_vm0, %v210_v21 }
  0x80   : > { %v293_v22 = vpop.permute.xlu0 %292 }
  0xa1   : > { %v254_v23 = vpop.f32.mrf.mxu0  ;;  %v277_v24 = vpop.f32.mrf.mxu1 }
  0xa2   : > { %v300_v25 = vadd.f32 %v293_v22, %v254_v23  ;;  %v301_v26 = vadd.f32 %v293_v22, %v277_v24 }
  0xa4   : > { %312 = vst [vmem:[%s208_s29] sm:$0xff] %v300_v25 }
  0xa5   : > { %v257_v27 = vpop.f32.mrf.mxu2  ;;  %313 = vst [vmem:[%s208_s29 + $0x8] sm:$0xff] %v301_v26  ;;  %v280_v28 = vpop.f32.mrf.mxu3 }
  0xa6   : > { %v306_v29 = vand.u32 2147483647, %v257_v27  ;;  %v307_v30 = vand.u32 2147483647, %v280_v28 }
  0xa8   : > { %314 = vst [vmem:[%s208_s29 + $0x10] sm:$0xff] %v306_v29 }
  0xa9   : > { %315 = vst [vmem:[%s208_s29 + $0x18] sm:$0xff] %v307_v30 }
  0xaa PF: > { %s13_s14 = sadd.s32 1, %s485_s14   ;;  %s578_s12 = smov %s481_s13 }
  0xab   : > { %p10_p5 = scmp.ge.s32.totalorder %s13_s14, 4   ;;  %s579_s13 = smov %s581_s15 }
  0xad   :  { %12 = sbr.rel (!%p10_p5) target bundleno = 2 (0x2), region = 62 }

</bundles_post_ra>
